<compile_context>
chip_gen: v5e
topology: v5e:2x2
jax: 0.10.0
libtpu: 0.0.40
codegen_flags: <defaults>
</compile_context>

<pallas_src>
import functools

import jax
import jax.numpy as jnp
from jax.experimental import pallas as pl
from jax.experimental.pallas import tpu as pltpu


def _round_up(x, m):
    return ((x + m - 1) // m) * m


# ----------------------------- Pallas kernel --------------------------------
def _matmul_bias_kernel(x_ref, w_ref, b_ref, o_ref):
    # o = x @ w + b : MXU matmul (bf16 inputs, f32 accumulation), bias broadcast over rows.
    o_ref[...] = (
        jnp.dot(x_ref[...], w_ref[...], preferred_element_type=jnp.float32)
        + b_ref[...]
    ).astype(o_ref.dtype)


def matmul_bias(x, w, b, *, tile_rows=2048):
    """x: (N, K) bf16, w: (K, Mp) bf16, b: (1, Mp) f32, Mp % 128 == 0  ->  (N, Mp) f32.

    Row-tiled 1-D grid: the weight matrix and bias stay resident in VMEM while the row
    (token) dimension is streamed with double-buffered DMA and sharded across TensorCores.
    """
    N, K = x.shape
    Mp = w.shape[1]
    assert Mp % 128 == 0, "pad the output column dimension to a multiple of 128"

    # Pick the row tile: large for pipelining, shrunk (and 8-aligned) for tiny inputs.
    tile = min(tile_rows, _round_up(N, 8))
    Np = _round_up(N, tile)
    if Np != N:
        x = jnp.pad(x, ((0, Np - N), (0, 0)))

    out = pl.pallas_call(
        _matmul_bias_kernel,
        out_shape=jax.ShapeDtypeStruct((Np, Mp), jnp.float32),
        grid_spec=pl.GridSpec(
            grid=(Np // tile,),
            in_specs=[
                pl.BlockSpec((tile, K), lambda i: (i, 0)),   # streamed activation rows
                pl.BlockSpec((K, Mp), lambda i: (0, 0)),     # resident weights
                pl.BlockSpec((1, Mp), lambda i: (0, 0)),     # resident bias
            ],
            out_specs=pl.BlockSpec((tile, Mp), lambda i: (i, 0)),
        ),
        compiler_params=pltpu.CompilerParams(
            dimension_semantics=("parallel",),               # megacore / 2-TC split on v7x
            vmem_limit_bytes=48 * 1024 * 1024,               # headroom under v7x's 64 MiB
        ),
    )(x, w, b)
    return out[:N] if Np != N else out


# ------------------------------- glue ---------------------------------------
M3 = 5 * 2 * 4 * 4          # 160  ConvTranspose3d fan-out columns (oc, dz, dh, dw)
MS = 4 * 4 * 4              # 64   ConvTranspose2d fan-out columns (oc, dh, dw)
M3P = _round_up(M3, 128)    # 256  lane-dense padded width
MSP = _round_up(MS, 128)    # 128


def crop(x, off_a, off_b, size_a, size_b):
    # TODO(synk): `crop` is not defined in the provided source; implemented as slicing the
    # trailing two spatial dims from the given offsets to at most the requested extents
    # (a no-op at the small test shapes used here).
    da = min(x.shape[-2] - off_a, size_a)
    db = min(x.shape[-1] - off_b, size_b)
    return x[..., off_a:off_a + da, off_b:off_b + db]


def make_params(dim, key):
    """Deterministic ConvTranspose weights (PyTorch layout: (C_in, C_out, *kernel))."""
    k1, k2, k3, k4 = jax.random.split(key, 4)
    w3 = jax.random.normal(k1, (dim, 5, 2, 4, 4), jnp.float32) * 0.02
    b3 = jax.random.normal(k2, (5,), jnp.float32) * 0.02
    ws = jax.random.normal(k3, (dim, 4, 4, 4), jnp.float32) * 0.02
    bs = jax.random.normal(k4, (4,), jnp.float32) * 0.02
    return {"w3": w3, "b3": b3, "ws": ws, "bs": bs}


def prepare_params(params):
    """Hoisted, loop-invariant weight prep: flatten, cast to bf16, pad columns to 128."""
    C = params["w3"].shape[0]
    w3_mat = params["w3"].reshape(C, M3).astype(jnp.bfloat16)
    w3_mat = jnp.pad(w3_mat, ((0, 0), (0, M3P - M3)))
    b3_cols = jnp.pad(jnp.repeat(params["b3"], 2 * 4 * 4), (0, M3P - M3)).reshape(1, M3P)
    ws_mat = params["ws"].reshape(C, MS).astype(jnp.bfloat16)
    ws_mat = jnp.pad(ws_mat, ((0, 0), (0, MSP - MS)))
    bs_cols = jnp.pad(jnp.repeat(params["bs"], 4 * 4), (0, MSP - MS)).reshape(1, MSP)
    return {"w3_mat": w3_mat, "b3_cols": b3_cols, "ws_mat": ws_mat, "bs_cols": bs_cols}


@functools.partial(jax.jit, static_argnums=(1, 2, 3))
def patch_recovery_forward(x, Z, H, W, prepped):
    """Mirrors PatchRecovery.forward(x, Z, H, W)."""
    B, L, C = x.shape
    assert L == Z * H * W

    # x.permute(0,2,1).reshape(B, C, Z, H, W) — done in bf16 to halve HBM traffic.
    xb = x.astype(jnp.bfloat16)
    xr = jnp.transpose(xb, (0, 2, 1)).reshape(B, C, Z, H, W)

    # ---- 3D branch: ConvTranspose3d on levels z = 1..Z-1 (stride == kernel => linear map) ----
    x3 = xr[:, :, 1:, :, :]                                   # (B, C, Z-1, H, W)
    Zu = Z - 1
    x3_rows = jnp.transpose(x3, (0, 2, 3, 4, 1)).reshape(B * Zu * H * W, C)
    y3 = matmul_bias(x3_rows, prepped["w3_mat"], prepped["b3_cols"])[:, :M3]
    y3 = y3.reshape(B, Zu, H, W, 5, 2, 4, 4)
    # scatter patches: out[b, oc, 2z+dz, 4h+dh, 4w+dw]  (fused with the consumer under jit)
    output = jnp.transpose(y3, (0, 4, 1, 5, 2, 6, 3, 7)).reshape(
        B, 5, 2 * Zu, 4 * H, 4 * W
    )

    # ---- surface branch: ConvTranspose2d on level z = 0 ----
    xs = xr[:, :, 0, :, :]                                    # (B, C, H, W)
    xs_rows = jnp.transpose(xs, (0, 2, 3, 1)).reshape(B * H * W, C)
    ys = matmul_bias(xs_rows, prepped["ws_mat"], prepped["bs_cols"])[:, :MS]
    ys = ys.reshape(B, H, W, 4, 4, 4)
    output_surface = jnp.transpose(ys, (0, 3, 1, 4, 2, 5)).reshape(
        B, 4, 4 * H, 4 * W
    )

    # ---- crop / slice / permute exactly as in the PyTorch forward ----
    output = crop(output, 0, 0, 1440, 721)
    output = output[0, :, 1:, :, :]
    output = jnp.transpose(output, (0, 1, 3, 2))

    output_surface = crop(output_surface, 0, 0, 1440, 721)
    output_surface = output_surface[0, :, :, :]
    output_surface = jnp.transpose(output_surface, (0, 2, 1))
    return output, output_surface


# ------------------------------ reference -----------------------------------
def _reference(x, Z, H, W, params):
    """Pure-JAX reference (direct transposed-conv expansion) for validation.

    Inputs/weights are rounded through bf16 (then upcast) to mirror the kernel's
    bf16-in / f32-accumulate MXU path, so the comparison stays tight.
    """
    B, L, C = x.shape
    xb = x.astype(jnp.bfloat16).astype(jnp.float32)
    w3 = params["w3"].astype(jnp.bfloat16).astype(jnp.float32)
    ws = params["ws"].astype(jnp.bfloat16).astype(jnp.float32)
    xr = jnp.transpose(xb, (0, 2, 1)).reshape(B, C, Z, H, W)
    x3 = xr[:, :, 1:, :, :]
    Zu = Z - 1
    o3 = jnp.einsum("bczhw,codef->bozdhewf", x3, w3)
    o3 = o3.reshape(B, 5, 2 * Zu, 4 * H, 4 * W) + params["b3"][None, :, None, None, None]
    xs = xr[:, :, 0, :, :]
    os = jnp.einsum("bchw,code->bohdwe", xs, ws)
    os = os.reshape(B, 4, 4 * H, 4 * W) + params["bs"][None, :, None, None]
    o3 = crop(o3, 0, 0, 1440, 721)[0, :, 1:, :, :]
    o3 = jnp.transpose(o3, (0, 1, 3, 2))
    os = crop(os, 0, 0, 1440, 721)[0]
    os = jnp.transpose(os, (0, 2, 1))
    return o3, os


# -------------------------------- main ---------------------------------------
if __name__ == "__main__":
    dim = 32          # hidden channels
    B, Z, H, W = 2, 3, 4, 4
    L = Z * H * W

    key = jax.random.PRNGKey(0)
    k_x, k_p = jax.random.split(key)
    x = jax.random.normal(k_x, (B, L, dim), jnp.float32)
    params = make_params(dim, k_p)
    prepped = prepare_params(params)   # loop-invariant weight prep, hoisted out of forward

    out, out_surface = patch_recovery_forward(x, Z, H, W, prepped)
    jax.block_until_ready(out)
    jax.block_until_ready(out_surface)

    ref_out, ref_surface = _reference(x, Z, H, W, params)
    assert out.shape == (5, 2 * (Z - 1) - 1, 4 * W, 4 * H), out.shape
    assert out_surface.shape == (4, 4 * W, 4 * H), out_surface.shape
    assert jnp.allclose(out, ref_out, atol=1e-3, rtol=1e-3)
    assert jnp.allclose(out_surface, ref_surface, atol=1e-3, rtol=1e-3)

    print("KERNEL_OK")
</pallas_src>

<mosaic_0001>
module attributes {stable_mosaic.version = 11 : i64} {
  func.func @_matmul_bias_kernel(%arg0: i32, %arg1: memref<64x32xbf16, #tpu.memory_space<vmem>>, %arg2: memref<32x256xbf16, #tpu.memory_space<vmem>>, %arg3: memref<1x256xf32, #tpu.memory_space<vmem>>, %arg4: memref<64x256xf32, #tpu.memory_space<vmem>>) attributes {dimension_semantics = [#tpu.dimension_semantics<parallel>], iteration_bounds = array<i64: 1>, scalar_prefetch = 0 : i64, scratch_operands = 0 : i64, tpu.core_type = #tpu.core_type<tc>, window_params = [{transform_indices = @transform_0, window_bounds = array<i64: 64, 32>}, {pipeline_mode = #tpu.pipeline_mode<synchronous>, transform_indices = @transform_1, window_bounds = array<i64: 32, 256>}, {pipeline_mode = #tpu.pipeline_mode<synchronous>, transform_indices = @transform_2, window_bounds = array<i64: 1, 256>}, {transform_indices = @transform_3, window_bounds = array<i64: 64, 256>}]} {
    %c0 = arith.constant 0 : index
    %c0_0 = arith.constant 0 : index
    %0 = vector.load %arg1[%c0, %c0_0] : memref<64x32xbf16, #tpu.memory_space<vmem>>, vector<64x32xbf16>
    %c0_1 = arith.constant 0 : index
    %c0_2 = arith.constant 0 : index
    %1 = vector.load %arg2[%c0_1, %c0_2] : memref<32x256xbf16, #tpu.memory_space<vmem>>, vector<32x256xbf16>
    %cst = arith.constant dense<0.000000e+00> : vector<64x256xf32>
    %2 = tpu.matmul %0, %1, %cst {dimension_numbers = #tpu.dot_dimension_numbers<[1], [0], [0], [1], [0, 0, 1, 1], [], []>} : vector<64x32xbf16>, vector<32x256xbf16>, vector<64x256xf32> -> vector<64x256xf32>
    %c0_3 = arith.constant 0 : index
    %c0_4 = arith.constant 0 : index
    %3 = vector.load %arg3[%c0_3, %c0_4] : memref<1x256xf32, #tpu.memory_space<vmem>>, vector<1x256xf32>
    %4 = vector.broadcast %3 : vector<1x256xf32> to vector<64x256xf32>
    %5 = arith.addf %2, %4 : vector<64x256xf32>
    %c0_5 = arith.constant 0 : index
    %c0_6 = arith.constant 0 : index
    %6 = vector.load %arg4[%c0_5, %c0_6] : memref<64x256xf32, #tpu.memory_space<vmem>>, vector<64x256xf32>
    tpu.vector_store %arg4[%c0_5, %c0_6], %5 {strides = array<i32>} : memref<64x256xf32, #tpu.memory_space<vmem>>, vector<64x256xf32>,
    return
  }
  func.func @transform_0(%arg0: i32) -> (i32, i32) {
    %c0_i32 = arith.constant 0 : i32
    %c0_i32_0 = arith.constant 0 : i32
    return %arg0, %c0_i32 : i32, i32
  }
  func.func @transform_1(%arg0: i32) -> (i32, i32) {
    %c0_i32 = arith.constant 0 : i32
    %c0_i32_0 = arith.constant 0 : i32
    %c0_i32_1 = arith.constant 0 : i32
    return %c0_i32, %c0_i32_0 : i32, i32
  }
  func.func @transform_2(%arg0: i32) -> (i32, i32) {
    %c0_i32 = arith.constant 0 : i32
    %c0_i32_0 = arith.constant 0 : i32
    %c0_i32_1 = arith.constant 0 : i32
    return %c0_i32, %c0_i32_0 : i32, i32
  }
  func.func @transform_3(%arg0: i32) -> (i32, i32) {
    %c0_i32 = arith.constant 0 : i32
    %c0_i32_0 = arith.constant 0 : i32
    return %arg0, %c0_i32 : i32, i32
  }
}

module attributes {stable_mosaic.version = 11 : i64} {
  func.func @_matmul_bias_kernel(%arg0: i32, %arg1: memref<32x32xbf16, #tpu.memory_space<vmem>>, %arg2: memref<32x128xbf16, #tpu.memory_space<vmem>>, %arg3: memref<1x128xf32, #tpu.memory_space<vmem>>, %arg4: memref<32x128xf32, #tpu.memory_space<vmem>>) attributes {dimension_semantics = [#tpu.dimension_semantics<parallel>], iteration_bounds = array<i64: 1>, scalar_prefetch = 0 : i64, scratch_operands = 0 : i64, tpu.core_type = #tpu.core_type<tc>, window_params = [{transform_indices = @transform_0, window_bounds = array<i64: 32, 32>}, {pipeline_mode = #tpu.pipeline_mode<synchronous>, transform_indices = @transform_1, window_bounds = array<i64: 32, 128>}, {pipeline_mode = #tpu.pipeline_mode<synchronous>, transform_indices = @transform_2, window_bounds = array<i64: 1, 128>}, {transform_indices = @transform_3, window_bounds = array<i64: 32, 128>}]} {
    %c0 = arith.constant 0 : index
    %c0_0 = arith.constant 0 : index
    %0 = vector.load %arg1[%c0, %c0_0] : memref<32x32xbf16, #tpu.memory_space<vmem>>, vector<32x32xbf16>
    %c0_1 = arith.constant 0 : index
    %c0_2 = arith.constant 0 : index
    %1 = vector.load %arg2[%c0_1, %c0_2] : memref<32x128xbf16, #tpu.memory_space<vmem>>, vector<32x128xbf16>
    %cst = arith.constant dense<0.000000e+00> : vector<32x128xf32>
    %2 = tpu.matmul %0, %1, %cst {dimension_numbers = #tpu.dot_dimension_numbers<[1], [0], [0], [1], [0, 0, 1, 1], [], []>} : vector<32x32xbf16>, vector<32x128xbf16>, vector<32x128xf32> -> vector<32x128xf32>
    %c0_3 = arith.constant 0 : index
    %c0_4 = arith.constant 0 : index
    %3 = vector.load %arg3[%c0_3, %c0_4] : memref<1x128xf32, #tpu.memory_space<vmem>>, vector<1x128xf32>
    %4 = vector.broadcast %3 : vector<1x128xf32> to vector<32x128xf32>
    %5 = arith.addf %2, %4 : vector<32x128xf32>
    %c0_5 = arith.constant 0 : index
    %c0_6 = arith.constant 0 : index
    %6 = vector.load %arg4[%c0_5, %c0_6] : memref<32x128xf32, #tpu.memory_space<vmem>>, vector<32x128xf32>
    tpu.vector_store %arg4[%c0_5, %c0_6], %5 {strides = array<i32>} : memref<32x128xf32, #tpu.memory_space<vmem>>, vector<32x128xf32>,
    return
  }
  func.func @transform_0(%arg0: i32) -> (i32, i32) {
    %c0_i32 = arith.constant 0 : i32
    %c0_i32_0 = arith.constant 0 : i32
    return %arg0, %c0_i32 : i32, i32
  }
  func.func @transform_1(%arg0: i32) -> (i32, i32) {
    %c0_i32 = arith.constant 0 : i32
    %c0_i32_0 = arith.constant 0 : i32
    %c0_i32_1 = arith.constant 0 : i32
    return %c0_i32, %c0_i32_0 : i32, i32
  }
  func.func @transform_2(%arg0: i32) -> (i32, i32) {
    %c0_i32 = arith.constant 0 : i32
    %c0_i32_0 = arith.constant 0 : i32
    %c0_i32_1 = arith.constant 0 : i32
    return %c0_i32, %c0_i32_0 : i32, i32
  }
  func.func @transform_3(%arg0: i32) -> (i32, i32) {
    %c0_i32 = arith.constant 0 : i32
    %c0_i32_0 = arith.constant 0 : i32
    return %arg0, %c0_i32 : i32, i32
  }
}

</mosaic_0001>

<bundles_post_ra>
// kernel: patch_recovery_forward.2
= control target key start
LH: loop header
LB: loop body
LE: loop exit
PB: predicated region body
PF: predicated region fallthrough
CT: control target
= control target key end

     0   :  { %8 = vsyncpa [#allocation3], 0  ;;  %s394_s0 = inlined_call_operand.vmem [shape: bf16[64,32], index: 0, kind: input, shape index: {}]   ;;  %s395_s1 = inlined_call_operand.hbm [shape: bf16[32,256], index: 1, kind: input, shape index: {}]   ;;  %s396_s2 = inlined_call_operand.hbm [shape: f32[1,256], index: 2, kind: input, shape index: {}]   ;;  %s397_s3 = inlined_call_operand.vmem [shape: f32[64,256], index: 3, kind: output, shape index: {}]  }
   0x1   :  { %s16_s14 = sshll.u32 %s395_s1, 4  ;;  %s17_s14 = int_to_ptr.hbm [resolvable:$true] %s16_s14 }
   0x2   :  { %9 = vsyncpa [#allocation5], 0  ;;  %s304_s15 = smov [#allocation2]   ;;  %s30_s19 = sshll.u32 %s396_s2, 4  ;;  %s31_s19 = int_to_ptr.hbm [resolvable:$true] %s30_s19 }
   0x3   :  { %s18_s16 = sshll.u32 %s304_s15, 4  ;;  %s305_s20 = smov 128   ;;  %s19_s16 = int_to_ptr.vmem [resolvable:$true] %s18_s16 }
   0x4   :  { %s306_s21 = smov 8   ;;  %s307_s22 = smov [#allocation4]  }
   0x5   :  { %24 = dma.hbm_to_vmem [thread:$0]  %s17_s14, 512, %s19_s16, [#allocation3], %s305_s20, %s305_s20, %s306_s21  }
   0x6   :  { %s32_s23 = sshll.u32 %s307_s22, 4  ;;  %s33_s23 = int_to_ptr.vmem [resolvable:$true] %s32_s23 }
   0x7   :  { %35 = dma.hbm_to_vmem [thread:$0]  %s31_s19, 32, %s33_s23, [#allocation5]  }
   0x8   :  { %300 = dma.done.wait [#allocation3], 512  }
   0x9   :  { %301 = vsyncadd [#allocation3], 4294966784 }
   0xa   :  { %302 = dma.done.wait [#allocation5], 32  }
   0xb   :  { %303 = vsyncadd [#allocation5], 4294967264  ;;  %v222_v0 = vld [vmem:[#allocation2 + $0x10] sm:$0xf]  ;;  %v243_v1 = vld [vmem:[#allocation2 + $0x14] sm:$0xf0] }
   0xc   :  { %v242_v2 = vld [vmem:[#allocation2 + $0x14] sm:$0xf]  ;;  %v223_v3 = vor.u32 %v243_v1, %v222_v0  ;;  %v224_v4 = vld [vmem:[#allocation2 + $0x18] sm:$0xf0]  ;;  %v214_v5 = vld [vmem:[#allocation2] sm:$0xf] }
   0xd   :  { %v241_v6 = vld [vmem:[#allocation2 + $0x4] sm:$0xf0]  ;;  %v227_v7 = vor.u32 %v242_v2, %v224_v4  ;;  %v240_v8 = vld [vmem:[#allocation2 + $0x4] sm:$0xf]  ;;  %v216_v9 = vld [vmem:[#allocation2 + $0x8] sm:$0xf0] }
   0xe   :  { %122 = vmatpush.bf16.msra.mxu0 %v223_v3  ;;  %244 = vmatpush.bf16.msra.mxu2 %v223_v3  ;;  %v215_v10 = vor.u32 %v241_v6, %v214_v5  ;;  %v219_v11 = vor.u32 %v240_v8, %v216_v9  ;;  %v236_v12 = vld [vmem:[%s394_s0] sm:$0xff]  ;;  %v238_v13 = vld [vmem:[%s394_s0 + $0x10] sm:$0xff]  ;;  %vm103_vm0 = vcmask 261120   ;;  %v237_v14 = vld [vmem:[%s394_s0 + $0x8] sm:$0xff] }
   0xf   :  { %151 = vmatpush.bf16.msra.mxu1 %v227_v7  ;;  %246 = vmatpush.bf16.msra.mxu3 %v227_v7  ;;  %v239_v15 = vld [vmem:[%s394_s0 + $0x18] sm:$0xff]  ;;  %v57_v16 = vld [vmem:[#allocation4] sm:$0x3] }
  0x10   :  { %v59_v17 = vperm.slane %v57_v16, 0  ;;  %v60_v18 = vperm.slane %v57_v16, 1 }
  0x12   :  { %123 = vmatpush.bf16.msra.mxu0 %v215_v10  ;;  %245 = vmatpush.bf16.msra.mxu2 %v215_v10 }
  0x13   :  { %152 = vmatpush.bf16.msra.mxu1 %v219_v11  ;;  %247 = vmatpush.bf16.msra.mxu3 %v219_v11 }
  0x15   :  { %228 = vmatmul.msk.bf16.vlgmr.msra.gmra.mxu0 %vm103_vm0, %v236_v12  ;;  %230 = vmatmul.msk.bf16.vlgmr.msra.gmra.mxu2 %vm103_vm0, %v238_v13 }
  0x16   :  { %232 = vmatmul.msk.bf16.vlgmr.msra.gmra.mxu1 %vm103_vm0, %v236_v12  ;;  %234 = vmatmul.msk.bf16.vlgmr.msra.gmra.mxu3 %vm103_vm0, %v238_v13 }
  0x25   :  { %229 = vmatmul.msk.bf16.gmra.mxu0 %vm103_vm0, %v237_v14  ;;  %231 = vmatmul.msk.bf16.gmra.mxu2 %vm103_vm0, %v239_v15 }
  0x26   :  { %233 = vmatmul.msk.bf16.gmra.mxu1 %vm103_vm0, %v237_v14  ;;  %235 = vmatmul.msk.bf16.gmra.mxu3 %vm103_vm0, %v239_v15 }
  0x92   :  { %v125_v19 = vpop.f32.mrf.mxu0 }
  0x93   :  { %v126_v20 = vadd.f32 %v125_v19, %v59_v17  ;;  %v154_v21 = vpop.f32.mrf.mxu1 }
  0x94   :  { %v155_v22 = vadd.f32 %v154_v21, %v60_v18 }
  0x95   :  { %174 = vst [vmem:[%s397_s3] sm:$0xff] %v126_v20 }
  0x96   :  { %175 = vst [vmem:[%s397_s3 + $0x8] sm:$0xff] %v155_v22 }
  0x98   :  { %v135_v23 = vpop.f32.mrf.mxu2 }
  0x99   :  { %v136_v24 = vadd.f32 %v135_v23, %v59_v17  ;;  %v164_v25 = vpop.f32.mrf.mxu3 }
  0x9a   :  { %v165_v26 = vadd.f32 %v164_v25, %v60_v18  ;;  %v127_v27 = vpop.f32.mrf.mxu0 }
  0x9b   :  { %182 = vst [vmem:[%s397_s3 + $0x40] sm:$0xff] %v136_v24  ;;  %v128_v28 = vadd.f32 %v127_v27, %v59_v17  ;;  %v156_v29 = vpop.f32.mrf.mxu1 }
  0x9c   :  { %183 = vst [vmem:[%s397_s3 + $0x48] sm:$0xff] %v165_v26  ;;  %v157_v30 = vadd.f32 %v156_v29, %v60_v18 }
  0x9d   :  { %176 = vst [vmem:[%s397_s3 + $0x10] sm:$0xff] %v128_v28 }
  0x9e   :  { %177 = vst [vmem:[%s397_s3 + $0x18] sm:$0xff] %v157_v30 }
  0xa0   :  { %v137_v31 = vpop.f32.mrf.mxu2 }
  0xa1   :  { %v138_v32 = vadd.f32 %v137_v31, %v59_v17  ;;  %v166_v33 = vpop.f32.mrf.mxu3 }
  0xa2   :  { %v167_v34 = vadd.f32 %v166_v33, %v60_v18  ;;  %v130_v35 = vpop.f32.mrf.mxu0 }
  0xa3   :  { %184 = vst [vmem:[%s397_s3 + $0x50] sm:$0xff] %v138_v32  ;;  %v131_v36 = vadd.f32 %v130_v35, %v59_v17  ;;  %v159_v37 = vpop.f32.mrf.mxu1 }
  0xa4   :  { %185 = vst [vmem:[%s397_s3 + $0x58] sm:$0xff] %v167_v34  ;;  %v160_v38 = vadd.f32 %v159_v37, %v60_v18 }
  0xa5   :  { %178 = vst [vmem:[%s397_s3 + $0x20] sm:$0xff] %v131_v36 }
  0xa6   :  { %179 = vst [vmem:[%s397_s3 + $0x28] sm:$0xff] %v160_v38 }
  0xa8   :  { %v140_v39 = vpop.f32.mrf.mxu2 }
  0xa9   :  { %v141_v40 = vadd.f32 %v140_v39, %v59_v17  ;;  %v169_v41 = vpop.f32.mrf.mxu3 }
  0xaa   :  { %v170_v42 = vadd.f32 %v169_v41, %v60_v18  ;;  %v132_v43 = vpop.f32.mrf.mxu0 }
  0xab   :  { %186 = vst [vmem:[%s397_s3 + $0x60] sm:$0xff] %v141_v40  ;;  %v133_v44 = vadd.f32 %v132_v43, %v59_v17  ;;  %v161_v45 = vpop.f32.mrf.mxu1 }
  0xac   :  { %187 = vst [vmem:[%s397_s3 + $0x68] sm:$0xff] %v170_v42  ;;  %v162_v46 = vadd.f32 %v161_v45, %v60_v18 }
  0xad   :  { %180 = vst [vmem:[%s397_s3 + $0x30] sm:$0xff] %v133_v44 }
  0xae   :  { %181 = vst [vmem:[%s397_s3 + $0x38] sm:$0xff] %v162_v46 }
  0xb0   :  { %v142_v47 = vpop.f32.mrf.mxu2 }
  0xb1   :  { %v143_v48 = vadd.f32 %v142_v47, %v59_v17  ;;  %v171_v49 = vpop.f32.mrf.mxu3 }
  0xb2   :  { %v172_v50 = vadd.f32 %v171_v49, %v60_v18 }
  0xb3   :  { %188 = vst [vmem:[%s397_s3 + $0x70] sm:$0xff] %v143_v48 }
  0xb4   :  { %189 = vst [vmem:[%s397_s3 + $0x78] sm:$0xff] %v172_v50 }
  0xb5   :  { %194 = vsyncpa [#allocation3], 1 }
  0xb6   :  { %195 = vsyncpa [#allocation5], 1 }

// kernel: patch_recovery_forward.3
= control target key start
LH: loop header
LB: loop body
LE: loop exit
PB: predicated region body
PF: predicated region fallthrough
CT: control target
= control target key end

     0   :  { %vm49_vm0 = vcmask 261120   ;;  %s155_s1 = inlined_call_operand.vmem [shape: bf16[32,128], index: 1, kind: input, shape index: {}]   ;;  %s156_s2 = inlined_call_operand.vmem [shape: f32[1,128], index: 2, kind: input, shape index: {}]   ;;  %s157_s0 = inlined_call_operand.vmem [shape: bf16[32,32], index: 0, kind: input, shape index: {}]   ;;  %s158_s3 = inlined_call_operand.vmem [shape: f32[32,128], index: 3, kind: output, shape index: {}]  }
   0x1   :  { %v104_v0 = vld [vmem:[%s155_s1 + $0x8] sm:$0xff]  ;;  %v103_v1 = vld [vmem:[%s155_s1] sm:$0xff] }
   0x2   :  { %62 = vmatpush.bf16.msra.mxu0 %v104_v0  ;;  %105 = vmatpush.bf16.msra.mxu1 %v104_v0  ;;  %v101_v2 = vld [vmem:[%s157_s0] sm:$0xff]  ;;  %v102_v3 = vld [vmem:[%s157_s0 + $0x8] sm:$0xff] }
   0x3   :  { %v107_v4 = vld [vmem:[%s156_s2] ss:$0 sm:$0xff] }
   0x6   :  { %63 = vmatpush.bf16.msra.mxu0 %v103_v1  ;;  %106 = vmatpush.bf16.msra.mxu1 %v103_v1 }
   0x9   :  { %99 = vmatmul.msk.bf16.vlgmr.msra.gmra.mxu0 %vm49_vm0, %v101_v2  ;;  %100 = vmatmul.msk.bf16.vlgmr.msra.gmra.mxu1 %vm49_vm0, %v102_v3 }
  0x86   :  { %v65_v5 = vpop.f32.mrf.mxu0  ;;  %v70_v6 = vpop.f32.mrf.mxu1 }
  0x87   :  { %v66_v7 = vadd.f32 %v107_v4, %v65_v5  ;;  %v71_v8 = vadd.f32 %v107_v4, %v70_v6 }
  0x89   :  { %75 = vst [vmem:[%s158_s3] sm:$0xff] %v66_v7 }
  0x8a   :  { %77 = vst [vmem:[%s158_s3 + $0x10] sm:$0xff] %v71_v8 }
  0x8e   :  { %v67_v9 = vpop.f32.mrf.mxu0  ;;  %v72_v10 = vpop.f32.mrf.mxu1 }
  0x8f   :  { %v68_v11 = vadd.f32 %v107_v4, %v67_v9  ;;  %v73_v12 = vadd.f32 %v107_v4, %v72_v10 }
  0x91   :  { %76 = vst [vmem:[%s158_s3 + $0x8] sm:$0xff] %v68_v11 }
  0x92   :  { %78 = vst [vmem:[%s158_s3 + $0x18] sm:$0xff] %v73_v12 }

// kernel: squeeze.5
= control target key start
LH: loop header
LB: loop body
LE: loop exit
PB: predicated region body
PF: predicated region fallthrough
CT: control target
= control target key end

     0   :  { %vm261_vm0 = vcmask 1047556   ;;  %s694_s15 = smov 12   ;;  %s991_s0 = inlined_call_operand.vmem [shape: f32[1,4,4,4,4,4], index: 0, kind: input, shape index: {}]   ;;  %s992_s1 = inlined_call_operand.hbm [shape: f32[4,16,16], index: 1, kind: output, shape index: {}]  }
   0x1   :  { %v657_v0 = vld [vmem:[%s991_s0 + $0x1c] sm:$0xf]  ;;  %v658_v1 = vld [vmem:[%s991_s0 + $0x18] sm:$0xf]  ;;  %v659_v2 = vld [vmem:[%s991_s0 + $0x14] sm:$0xf] }
   0x2   :  { %232 = vst [vmem:[#allocation2 + $0x38] sm:$0xf] %v657_v0  ;;  %v660_v3 = vld [vmem:[%s991_s0 + $0x10] sm:$0xf]  ;;  %v661_v4 = vld [vmem:[%s991_s0 + $0xc] sm:$0xf] }
   0x3   :  { %236 = vst [vmem:[#allocation2 + $0x30] sm:$0xf] %v658_v1  ;;  %v662_v5 = vld [vmem:[%s991_s0 + $0x8] sm:$0xf]  ;;  %v663_v6 = vld [vmem:[%s991_s0 + $0x4] sm:$0xf] }
   0x4   :  { %240 = vst [vmem:[#allocation2 + $0x28] sm:$0xf] %v659_v2  ;;  %v257_v7 = vld [vmem:[%s991_s0] sm:$0xf]  ;;  %v649_v8 = vld [vmem:[%s991_s0 + $0x3c] sm:$0xf] }
   0x5   :  { %244 = vst [vmem:[#allocation2 + $0x20] sm:$0xf] %v660_v3  ;;  %v650_v9 = vld [vmem:[%s991_s0 + $0x38] sm:$0xf]  ;;  %v651_v10 = vld [vmem:[%s991_s0 + $0x34] sm:$0xf] }
   0x6   :  { %248 = vst [vmem:[#allocation2 + $0x18] sm:$0xf] %v661_v4  ;;  %v652_v11 = vld [vmem:[%s991_s0 + $0x30] sm:$0xf]  ;;  %v653_v12 = vld [vmem:[%s991_s0 + $0x2c] sm:$0xf] }
   0x7   :  { %252 = vst [vmem:[#allocation2 + $0x10] sm:$0xf] %v662_v5  ;;  %v654_v13 = vld [vmem:[%s991_s0 + $0x28] sm:$0xf]  ;;  %v655_v14 = vld [vmem:[%s991_s0 + $0x24] sm:$0xf] }
   0x8   :  { %256 = vst [vmem:[#allocation2 + $0x8] sm:$0xf] %v663_v6  ;;  %v656_v15 = vld [vmem:[%s991_s0 + $0x20] sm:$0xf]  ;;  %v625_v17 = vld [vmem:[%s991_s0 + $0x9c] sm:$0xf] }
   0x9   :  { %258 = vst [vmem:[#allocation2] sm:$0xf] %v257_v7  ;;  %v626_v18 = vld [vmem:[%s991_s0 + $0x98] sm:$0xf]  ;;  %v627_v21 = vld [vmem:[%s991_s0 + $0x94] sm:$0xf] }
   0xa   :  { %200 = vst [vmem:[#allocation2 + $0x78] sm:$0xf] %v649_v8  ;;  %v628_v22 = vld [vmem:[%s991_s0 + $0x90] sm:$0xf]  ;;  %v629_v23 = vld [vmem:[%s991_s0 + $0x8c] sm:$0xf] }
   0xb   :  { %204 = vst [vmem:[#allocation2 + $0x70] sm:$0xf] %v650_v9  ;;  %v630_v24 = vld [vmem:[%s991_s0 + $0x88] sm:$0xf]  ;;  %v631_v25 = vld [vmem:[%s991_s0 + $0x84] sm:$0xf] }
   0xc   :  { %208 = vst [vmem:[#allocation2 + $0x68] sm:$0xf] %v651_v10  ;;  %v331_v16 = vld [vmem:[#allocation2 + $0x3] ss:$8 sm:$0xf0]  }
   0xd   :  { %212 = vst [vmem:[#allocation2 + $0x60] sm:$0xf] %v652_v11  ;;  %v632_v26 = vld [vmem:[%s991_s0 + $0x80] sm:$0xf]  ;;  %v617_v28 = vld [vmem:[%s991_s0 + $0xbc] sm:$0xf] }
   0xe   :  { %216 = vst [vmem:[#allocation2 + $0x58] sm:$0xf] %v653_v12  ;;  %v618_v29 = vld [vmem:[%s991_s0 + $0xb8] sm:$0xf]  ;;  %v619_v32 = vld [vmem:[%s991_s0 + $0xb4] sm:$0xf] }
   0xf   :  { %220 = vst [vmem:[#allocation2 + $0x50] sm:$0xf] %v654_v13  ;;  %v620_v33 = vld [vmem:[%s991_s0 + $0xb0] sm:$0xf]  ;;  %v621_v34 = vld [vmem:[%s991_s0 + $0xac] sm:$0xf] }
  0x10   :  { %v329_v19 = vld [vmem:[#allocation2 + $0x3] ss:$8 sm:$0xf]   ;;  %224 = vst [vmem:[#allocation2 + $0x48] sm:$0xf] %v655_v14 }
  0x11   :  { %v333_v20 = vsel %vm261_vm0, %v331_v16, %v329_v19  ;;  %228 = vst [vmem:[#allocation2 + $0x40] sm:$0xf] %v656_v15  ;;  %v622_v35 = vld [vmem:[%s991_s0 + $0xa8] sm:$0xf]  ;;  %v623_v36 = vld [vmem:[%s991_s0 + $0xa4] sm:$0xf] }
  0x12   :  { %334 = vrot.lane.b32.xlu0 %v333_v20, %s694_s15  ;;  %104 = vst [vmem:[#allocation2 + $0x138] sm:$0xf] %v625_v17  ;;  %v624_v37 = vld [vmem:[%s991_s0 + $0xa0] sm:$0xf]  ;;  %v633_v39 = vld [vmem:[%s991_s0 + $0x7c] sm:$0xf] }
  0x13   :  { %108 = vst [vmem:[#allocation2 + $0x130] sm:$0xf] %v626_v18  ;;  %v634_v40 = vld [vmem:[%s991_s0 + $0x78] sm:$0xf]  ;;  %v635_v43 = vld [vmem:[%s991_s0 + $0x74] sm:$0xf] }
  0x14   :  { %112 = vst [vmem:[#allocation2 + $0x128] sm:$0xf] %v627_v21  ;;  %v352_v27 = vld [vmem:[#allocation2 + $0x43] ss:$8 sm:$0xf0]  }
  0x15   :  { %116 = vst [vmem:[#allocation2 + $0x120] sm:$0xf] %v628_v22  ;;  %v636_v44 = vld [vmem:[%s991_s0 + $0x70] sm:$0xf]  ;;  %v637_v45 = vld [vmem:[%s991_s0 + $0x6c] sm:$0xf] }
  0x16   :  { %120 = vst [vmem:[#allocation2 + $0x118] sm:$0xf] %v629_v23  ;;  %v638_v46 = vld [vmem:[%s991_s0 + $0x68] sm:$0xf]  ;;  %v639_v47 = vld [vmem:[%s991_s0 + $0x64] sm:$0xf] }
  0x17   :  { %124 = vst [vmem:[#allocation2 + $0x110] sm:$0xf] %v630_v24  ;;  %v640_v48 = vld [vmem:[%s991_s0 + $0x60] sm:$0xf]  ;;  %v601_v50 = vld [vmem:[%s991_s0 + $0xfc] sm:$0xf] }
  0x18   :  { %v350_v30 = vld [vmem:[#allocation2 + $0x43] ss:$8 sm:$0xf]   ;;  %128 = vst [vmem:[#allocation2 + $0x108] sm:$0xf] %v631_v25 }
  0x19   :  { %v354_v31 = vsel %vm261_vm0, %v352_v27, %v350_v30  ;;  %132 = vst [vmem:[#allocation2 + $0x100] sm:$0xf] %v632_v26  ;;  %v602_v51 = vld [vmem:[%s991_s0 + $0xf8] sm:$0xf]  ;;  %v603_v54 = vld [vmem:[%s991_s0 + $0xf4] sm:$0xf] }
  0x1a   :  { %355 = vrot.lane.b32.xlu1 %v354_v31, %s694_s15  ;;  %72 = vst [vmem:[#allocation2 + $0x178] sm:$0xf] %v617_v28  ;;  %v604_v55 = vld [vmem:[%s991_s0 + $0xf0] sm:$0xf]  ;;  %v605_v56 = vld [vmem:[%s991_s0 + $0xec] sm:$0xf] }
  0x1b   :  { %76 = vst [vmem:[#allocation2 + $0x170] sm:$0xf] %v618_v29  ;;  %v606_v57 = vld [vmem:[%s991_s0 + $0xe8] sm:$0xf]  ;;  %v607_v58 = vld [vmem:[%s991_s0 + $0xe4] sm:$0xf] }
  0x1c   :  { %80 = vst [vmem:[#allocation2 + $0x168] sm:$0xf] %v619_v32  ;;  %v341_v38 = vld [vmem:[#allocation2 + $0x103] ss:$8 sm:$0xf0]  }
  0x1d   :  { %84 = vst [vmem:[#allocation2 + $0x160] sm:$0xf] %v620_v33  ;;  %v608_v59 = vld [vmem:[%s991_s0 + $0xe0] sm:$0xf]  ;;  %v641_v60 = vld [vmem:[%s991_s0 + $0x5c] sm:$0xf] }
  0x1e   :  { %88 = vst [vmem:[#allocation2 + $0x158] sm:$0xf] %v621_v34  ;;  %v642_v62 = vld [vmem:[%s991_s0 + $0x58] sm:$0xf]  ;;  %v643_v63 = vld [vmem:[%s991_s0 + $0x54] sm:$0xf] }
  0x1f   :  { %92 = vst [vmem:[#allocation2 + $0x150] sm:$0xf] %v622_v35  ;;  %v644_v2 = vld [vmem:[%s991_s0 + $0x50] sm:$0xf] }
  0x20   :  { %v339_v41 = vld [vmem:[#allocation2 + $0x103] ss:$8 sm:$0xf]   ;;  %96 = vst [vmem:[#allocation2 + $0x148] sm:$0xf] %v623_v36 }
  0x21   :  { %v343_v42 = vsel %vm261_vm0, %v341_v38, %v339_v41  ;;  %100 = vst [vmem:[#allocation2 + $0x140] sm:$0xf] %v624_v37 }
  0x22   :  { %344 = vrot.lane.b32.xlu0 %v343_v42, %s694_s15  ;;  %136 = vst [vmem:[#allocation2 + $0xf8] sm:$0xf] %v633_v39 }
  0x23   :  { %140 = vst [vmem:[#allocation2 + $0xf0] sm:$0xf] %v634_v40 }
  0x24   :  { %144 = vst [vmem:[#allocation2 + $0xe8] sm:$0xf] %v635_v43  ;;  %v363_v49 = vld [vmem:[#allocation2 + $0x143] ss:$8 sm:$0xf0]  }
  0x25   :  { %148 = vst [vmem:[#allocation2 + $0xe0] sm:$0xf] %v636_v44 }
  0x26   :  { %152 = vst [vmem:[#allocation2 + $0xd8] sm:$0xf] %v637_v45 }
  0x27   :  { %156 = vst [vmem:[#allocation2 + $0xd0] sm:$0xf] %v638_v46 }
  0x28   :  { %v361_v52 = vld [vmem:[#allocation2 + $0x143] ss:$8 sm:$0xf]   ;;  %160 = vst [vmem:[#allocation2 + $0xc8] sm:$0xf] %v639_v47 }
  0x29   :  { %v365_v53 = vsel %vm261_vm0, %v363_v49, %v361_v52  ;;  %164 = vst [vmem:[#allocation2 + $0xc0] sm:$0xf] %v640_v48 }
  0x2a   :  { %366 = vrot.lane.b32.xlu1 %v365_v53, %s694_s15  ;;  %8 = vst [vmem:[#allocation2 + $0x1f8] sm:$0xf] %v601_v50 }
  0x2b   :  { %12 = vst [vmem:[#allocation2 + $0x1f0] sm:$0xf] %v602_v51 }
  0x2c   :  { %16 = vst [vmem:[#allocation2 + $0x1e8] sm:$0xf] %v603_v54  ;;  %v396_v61 = vld [vmem:[#allocation2 + $0xc3] ss:$8 sm:$0xf0]  }
  0x2d   :  { %20 = vst [vmem:[#allocation2 + $0x1e0] sm:$0xf] %v604_v55 }
  0x2e   :  { %24 = vst [vmem:[#allocation2 + $0x1d8] sm:$0xf] %v605_v56 }
  0x2f   :  { %28 = vst [vmem:[#allocation2 + $0x1d0] sm:$0xf] %v606_v57 }
  0x30   :  { %v394_v0 = vld [vmem:[#allocation2 + $0xc3] ss:$8 sm:$0xf]   ;;  %32 = vst [vmem:[#allocation2 + $0x1c8] sm:$0xf] %v607_v58 }
  0x31   :  { %v398_v1 = vsel %vm261_vm0, %v396_v61, %v394_v0  ;;  %36 = vst [vmem:[#allocation2 + $0x1c0] sm:$0xf] %v608_v59 }
  0x32   :  { %2 = vsyncpa [#allocation1], 0  ;;  %399 = vrot.lane.b32.xlu0 %v398_v1, %s694_s15  ;;  %168 = vst [vmem:[#allocation2 + $0xb8] sm:$0xf] %v641_v60  ;;  %v645_v3 = vld [vmem:[%s991_s0 + $0x4c] sm:$0xf] }
  0x33   :  { %v646_v4 = vld [vmem:[%s991_s0 + $0x48] sm:$0xf]  ;;  %172 = vst [vmem:[#allocation2 + $0xb0] sm:$0xf] %v642_v62  ;;  %v647_v7 = vld [vmem:[%s991_s0 + $0x44] sm:$0xf] }
  0x34   :  { %v426_v5 = vld [vmem:[#allocation2 + $0x102] ss:$8 sm:$0xf]   ;;  %176 = vst [vmem:[#allocation2 + $0xa8] sm:$0xf] %v643_v63  ;;  %s695_s9 = smov 8  }
  0x35   :  { %v428_v6 = vld [vmem:[#allocation2 + $0x102] ss:$8 sm:$0xf0]   ;;  %180 = vst [vmem:[#allocation2 + $0xa0] sm:$0xf] %v644_v2  ;;  %vm263_vm1 = vcmask 31744  }
  0x36   :  { %v648_v8 = vld [vmem:[%s991_s0 + $0x40] sm:$0xf]  ;;  %184 = vst [vmem:[#allocation2 + $0x98] sm:$0xf] %v645_v3  ;;  %v430_v10 = vsel %vm261_vm0, %v428_v6, %v426_v5  ;;  %v609_v11 = vld [vmem:[%s991_s0 + $0xdc] sm:$0xf] }
  0x37   :  { %v407_v9 = vld [vmem:[#allocation2 + $0x1c3] ss:$8 sm:$0xf0]   ;;  %188 = vst [vmem:[#allocation2 + $0x90] sm:$0xf] %v646_v4  ;;  %vm336_vm2 = vcmask 130144  }
  0x38   :  { %v610_v12 = vld [vmem:[%s991_s0 + $0xd8] sm:$0xf]  ;;  %192 = vst [vmem:[#allocation2 + $0x88] sm:$0xf] %v647_v7  ;;  %v611_v17 = vld [vmem:[%s991_s0 + $0xd4] sm:$0xf] }
  0x39   :  { %v405_v13 = vld [vmem:[#allocation2 + $0x1c3] ss:$8 sm:$0xf]   ;;  %196 = vst [vmem:[#allocation2 + $0x80] sm:$0xf] %v648_v8  ;;  %vm423_vm3 = vcmask 97344  }
  0x3a   :  { %v409_v14 = vsel %vm261_vm0, %v407_v9, %v405_v13  ;;  %431 = vrot.lane.b32.xlu0 %v430_v10, %s695_s9  ;;  %v437_v15 = vld [vmem:[#allocation2 + $0x42] ss:$8 sm:$0xf]   ;;  %40 = vst [vmem:[#allocation2 + $0x1b8] sm:$0xf] %v609_v11  ;;  %vm510_vm4 = vcmask 64544  }
  0x3b   :  { %410 = vrot.lane.b32.xlu1 %v409_v14, %s694_s15  ;;  %v439_v16 = vld [vmem:[#allocation2 + $0x42] ss:$8 sm:$0xf0]   ;;  %44 = vst [vmem:[#allocation2 + $0x1b0] sm:$0xf] %v610_v12  ;;  %s594_s1 = sshll.u32 %s992_s1, 4  ;;  %s595_s1 = int_to_ptr.hbm [resolvable:$true] %s594_s1 }
  0x3c   :  { %v612_v18 = vld [vmem:[%s991_s0 + $0xd0] sm:$0xf]  ;;  %v613_v19 = vld [vmem:[%s991_s0 + $0xcc] sm:$0xf]  ;;  %v614_v20 = vld [vmem:[%s991_s0 + $0xc8] sm:$0xf]  ;;  %v441_v23 = vsel %vm261_vm0, %v439_v16, %v437_v15 }
  0x3d   :  { %v374_v21 = vld [vmem:[#allocation2 + $0x83] ss:$8 sm:$0xf0]   ;;  %48 = vst [vmem:[#allocation2 + $0x1a8] sm:$0xf] %v611_v17 }
  0x3e   :  { %v461_v22 = vld [vmem:[#allocation2 + $0x82] ss:$8 sm:$0xf0]   ;;  %52 = vst [vmem:[#allocation2 + $0x1a0] sm:$0xf] %v612_v18 }
  0x3f   :  { %56 = vst [vmem:[#allocation2 + $0x198] sm:$0xf] %v613_v19  ;;  %v615_v24 = vld [vmem:[%s991_s0 + $0xc4] sm:$0xf]  ;;  %v616_v25 = vld [vmem:[%s991_s0 + $0xc0] sm:$0xf] }
  0x40   :  { %v372_v26 = vld [vmem:[#allocation2 + $0x83] ss:$8 sm:$0xf]   ;;  %v459_v27 = vld [vmem:[#allocation2 + $0x82] ss:$8 sm:$0xf]  }
  0x41   :  { %v376_v28 = vsel %vm261_vm0, %v374_v21, %v372_v26  ;;  %v463_v29 = vsel %vm261_vm0, %v461_v22, %v459_v27  ;;  %60 = vst [vmem:[#allocation2 + $0x190] sm:$0xf] %v614_v20  ;;  %v492_v30 = vld [vmem:[#allocation2 + $0x1c2] ss:$8 sm:$0xf]   ;;  %s696_s0 = smov 4  }
  0x42   :  { %377 = vrot.lane.b32.xlu2 %v376_v28, %s694_s15  ;;  %64 = vst [vmem:[#allocation2 + $0x188] sm:$0xf] %v615_v24  ;;  %464 = vrot.lane.b32.xlu0 %v463_v29, %s695_s9  ;;  %v494_v31 = vld [vmem:[#allocation2 + $0x1c2] ss:$8 sm:$0xf0]  }
  0x43   :  { %442 = vrot.lane.b32.xlu1 %v441_v23, %s695_s9  ;;  %68 = vst [vmem:[#allocation2 + $0x180] sm:$0xf] %v616_v25  ;;  %v496_v34 = vsel %vm261_vm0, %v494_v31, %v492_v30  ;;  %v416_v39 = vld [vmem:[#allocation2 + $0x2] ss:$8 sm:$0xf]  }
  0x44   :  { %v418_v40 = vld [vmem:[#allocation2 + $0x2] ss:$8 sm:$0xf0]   ;;  %v524_v41 = vld [vmem:[#allocation2 + $0x41] ss:$8 sm:$0xf]  }
  0x45   :  { %v385_v32 = vld [vmem:[#allocation2 + $0x183] ss:$8 sm:$0xf0]   ;;  %v472_v33 = vld [vmem:[#allocation2 + $0x182] ss:$8 sm:$0xf0]   ;;  %v420_v46 = vsel %vm261_vm0, %v418_v40, %v416_v39 }
  0x46   :  { %v526_v42 = vld [vmem:[#allocation2 + $0x41] ss:$8 sm:$0xf0]   ;;  %v448_v48 = vld [vmem:[#allocation2 + $0x142] ss:$8 sm:$0xf]  }
  0x47   :  { %v503_v43 = vld [vmem:[#allocation2 + $0x1] ss:$8 sm:$0xf]   ;;  %v528_v45 = vsel %vm261_vm0, %v526_v42, %v524_v41  ;;  %v450_v49 = vld [vmem:[#allocation2 + $0x142] ss:$8 sm:$0xf0]  }
  0x48   :  { %v505_v44 = vld [vmem:[#allocation2 + $0x1] ss:$8 sm:$0xf0]   ;;  %v452_v55 = vsel %vm261_vm0, %v450_v49, %v448_v48  ;;  %v481_v57 = vld [vmem:[#allocation2 + $0xc2] ss:$8 sm:$0xf]  }
  0x49   :  { %v507_v47 = vsel %vm261_vm0, %v505_v44, %v503_v43  ;;  %v559_v51 = vld [vmem:[#allocation2 + $0x181] ss:$8 sm:$0xf0]   ;;  %v483_v58 = vld [vmem:[#allocation2 + $0xc2] ss:$8 sm:$0xf0]  }
  0x4a   :  { %v383_v35 = vld [vmem:[#allocation2 + $0x183] ss:$8 sm:$0xf]   ;;  %v470_v36 = vld [vmem:[#allocation2 + $0x182] ss:$8 sm:$0xf]   ;;  %497 = vrot.lane.b32.xlu0 %v496_v34, %s695_s9  ;;  %v485_v61 = vsel %vm261_vm0, %v483_v58, %v481_v57 }
  0x4b   :  { %v387_v37 = vsel %vm261_vm0, %v385_v32, %v383_v35  ;;  %v474_v38 = vsel %vm261_vm0, %v472_v33, %v470_v36  ;;  %v557_v50 = vld [vmem:[#allocation2 + $0x181] ss:$8 sm:$0xf]   ;;  %v259_v63 = vld [vmem:[#allocation2] ss:$8 sm:$0xf]  }
  0x4c   :  { %388 = vrot.lane.b32.xlu2 %v387_v37, %s694_s15  ;;  %475 = vrot.lane.b32.xlu1 %v474_v38, %s695_s9  ;;  %v535_v52 = vld [vmem:[#allocation2 + $0x141] ss:$8 sm:$0xf]   ;;  %v561_v54 = vsel %vm261_vm0, %v559_v51, %v557_v50  ;;  %v260_v0 = vld [vmem:[#allocation2] ss:$8 sm:$0xf0]  }
  0x4d   :  { %v537_v53 = vld [vmem:[#allocation2 + $0x141] ss:$8 sm:$0xf0]   ;;  %v262_v2 = vsel %vm261_vm0, %v260_v0, %v259_v63  ;;  %v266_v5 = vld [vmem:[#allocation2 + $0x40] ss:$8 sm:$0xf]  }
  0x4e   :  { %v539_v56 = vsel %vm261_vm0, %v537_v53, %v535_v52  ;;  %v568_v59 = vld [vmem:[#allocation2 + $0xc1] ss:$8 sm:$0xf]   ;;  %264 = vst.msk [vmem:[#allocation0] sm:$0xff] %vm263_vm1, %v262_v2   ;;  %s697_s15 = smov [#allocation0]  }
  0x4f   :  { %v570_v60 = vld [vmem:[#allocation2 + $0xc1] ss:$8 sm:$0xf0]   ;;  %v268_v6 = vld [vmem:[#allocation2 + $0x40] ss:$8 sm:$0xf0]  }
  0x50   :  { %v572_v62 = vsel %vm261_vm0, %v570_v60, %v568_v59  ;;  %v513_v1 = vld [vmem:[#allocation2 + $0x101] ss:$8 sm:$0xf]   ;;  %v270_v8 = vsel %vm261_vm0, %v268_v6, %v266_v5  ;;  %v275_v14 = vld [vmem:[#allocation2 + $0x80] ss:$8 sm:$0xf]  }
  0x51   :  { %v515_v3 = vld [vmem:[#allocation2 + $0x101] ss:$8 sm:$0xf0]   ;;  %273 = vst.msk [vmem:[#allocation0 + $0x8] sm:$0xff] %vm263_vm1, %v270_v8   ;;  %s592_s23 = sshll.u32 %s697_s15, 4  ;;  %s593_s23 = int_to_ptr.vmem [resolvable:$true] %s592_s23 }
  0x52   :  { %529 = vrot.lane.b32.xlu0 %v528_v45, %s696_s0  ;;  %v517_v4 = vsel %vm261_vm0, %v515_v3, %v513_v1  ;;  %v546_v7 = vld [vmem:[#allocation2 + $0x81] ss:$8 sm:$0xf]   ;;  %v277_v15 = vld [vmem:[#allocation2 + $0x80] ss:$8 sm:$0xf0]  }
  0x53   :  { %v548_v9 = vld [vmem:[#allocation2 + $0x81] ss:$8 sm:$0xf0]   ;;  %v279_v16 = vsel %vm261_vm0, %v277_v15, %v275_v14  ;;  %v293_v17 = vld [vmem:[#allocation2 + $0x100] ss:$8 sm:$0xf]  }
  0x54   :  { %421 = vrot.lane.b32.xlu2 %v420_v46, %s695_s9  ;;  %508 = vrot.lane.b32.xlu1 %v507_v47, %s696_s0  ;;  %v550_v10 = vsel %vm261_vm0, %v548_v9, %v546_v7  ;;  %v579_v11 = vld [vmem:[#allocation2 + $0x1c1] ss:$8 sm:$0xf]   ;;  %v295_v18 = vld [vmem:[#allocation2 + $0x100] ss:$8 sm:$0xf0]  }
  0x55   :  { %v581_v12 = vld [vmem:[#allocation2 + $0x1c1] ss:$8 sm:$0xf0]   ;;  %282 = vst.msk [vmem:[#allocation0 + $0x10] sm:$0xff] %vm263_vm1, %v279_v16   ;;  %v297_v19 = vsel %vm261_vm0, %v295_v18, %v293_v17 }
  0x56   :  { %v583_v13 = vsel %vm261_vm0, %v581_v12, %v579_v11  ;;  %v302_v20 = vld [vmem:[#allocation2 + $0x140] ss:$8 sm:$0xf]   ;;  %300 = vst.msk [vmem:[#allocation0 + $0x20] sm:$0xff] %vm263_vm1, %v297_v19  }
  0x57   :  { %v304_v21 = vld [vmem:[#allocation2 + $0x140] ss:$8 sm:$0xf0]  }
  0x58   :  { %v306_v22 = vsel %vm261_vm0, %v304_v21, %v302_v20  ;;  %v311_v23 = vld [vmem:[#allocation2 + $0x180] ss:$8 sm:$0xf]  }
  0x59   :  { %309 = vst.msk [vmem:[#allocation0 + $0x28] sm:$0xff] %vm263_vm1, %v306_v22   ;;  %v313_v25 = vld [vmem:[#allocation2 + $0x180] ss:$8 sm:$0xf0]  }
  0x5a   :  { %562 = vrot.lane.b32.xlu0 %v561_v54, %s696_s0  ;;  %v315_v26 = vsel %vm261_vm0, %v313_v25, %v311_v23  ;;  %v284_v27 = vld [vmem:[#allocation2 + $0xc0] ss:$8 sm:$0xf]  }
  0x5b   :  { %318 = vst.msk [vmem:[#allocation0 + $0x30] sm:$0xff] %vm263_vm1, %v315_v26   ;;  %v286_v28 = vld [vmem:[#allocation2 + $0xc0] ss:$8 sm:$0xf0]  }
  0x5c   :  { %453 = vrot.lane.b32.xlu2 %v452_v55, %s695_s9  ;;  %540 = vrot.lane.b32.xlu1 %v539_v56, %s696_s0  ;;  %v288_v29 = vsel %vm261_vm0, %v286_v28, %v284_v27  ;;  %v320_v31 = vld [vmem:[#allocation2 + $0x1c0] ss:$8 sm:$0xf]  }
  0x5d   :  { %291 = vst.msk [vmem:[#allocation0 + $0x18] sm:$0xff] %vm263_vm1, %v288_v29   ;;  %v322_v32 = vld [vmem:[#allocation2 + $0x1c0] ss:$8 sm:$0xf0]  }
  0x5e   :  { %v324_v33 = vsel %vm261_vm0, %v322_v32, %v320_v31 }
  0x5f   :  { %327 = vst.msk [vmem:[#allocation0 + $0x38] sm:$0xff] %vm263_vm1, %v324_v33  }
  0x64   :  { %486 = vrot.lane.b32.xlu2 %v485_v61, %s695_s9  ;;  %573 = vrot.lane.b32.xlu1 %v572_v62, %s696_s0 }
  0x6c   :  { %518 = vrot.lane.b32.xlu2 %v517_v4, %s696_s0 }
  0x74   :  { %551 = vrot.lane.b32.xlu2 %v550_v10, %s696_s0 }
  0x7c   :  { %584 = vrot.lane.b32.xlu2 %v583_v13, %s696_s0 }
  0x84   :  { %v335_v24 = vpop.permute.xlu0 %334  }
  0x85   :  { %337 = vst.msk [vmem:[#allocation0] sm:$0xff] %vm336_vm2, %v335_v24  }
  0x8c   :  { %v356_v30 = vpop.permute.xlu1 %355  }
  0x8d   :  { %359 = vst.msk [vmem:[#allocation0 + $0x8] sm:$0xff] %vm336_vm2, %v356_v30  }
  0x94   :  { %v345_v34 = vpop.permute.xlu0 %344  }
  0x95   :  { %348 = vst.msk [vmem:[#allocation0 + $0x20] sm:$0xff] %vm336_vm2, %v345_v34  }
  0x9c   :  { %v378_v35 = vpop.permute.xlu2 %377   ;;  %v367_v36 = vpop.permute.xlu1 %366  }
  0x9d   :  { %381 = vst.msk [vmem:[#allocation0 + $0x10] sm:$0xff] %vm336_vm2, %v378_v35  }
  0x9e   :  { %370 = vst.msk [vmem:[#allocation0 + $0x28] sm:$0xff] %vm336_vm2, %v367_v36  }
  0xa4   :  { %v400_v37 = vpop.permute.xlu0 %399  }
  0xa5   :  { %403 = vst.msk [vmem:[#allocation0 + $0x18] sm:$0xff] %vm336_vm2, %v400_v37  }
  0xa6   :  { %v389_v38 = vpop.permute.xlu2 %388  }
  0xa7   :  { %392 = vst.msk [vmem:[#allocation0 + $0x30] sm:$0xff] %vm336_vm2, %v389_v38  }
  0xac   :  { %v432_v40 = vpop.permute.xlu0 %431  }
  0xad   :  { %v411_v39 = vpop.permute.xlu1 %410   ;;  %435 = vst.msk [vmem:[#allocation0 + $0x20] sm:$0xff] %vm423_vm3, %v432_v40  }
  0xae   :  { %414 = vst.msk [vmem:[#allocation0 + $0x38] sm:$0xff] %vm336_vm2, %v411_v39   ;;  %v422_v41 = vpop.permute.xlu2 %421  }
  0xaf   :  { %424 = vst.msk [vmem:[#allocation0] sm:$0xff] %vm423_vm3, %v422_v41  }
  0xb4   :  { %v465_v43 = vpop.permute.xlu0 %464  }
  0xb5   :  { %v443_v42 = vpop.permute.xlu1 %442   ;;  %468 = vst.msk [vmem:[#allocation0 + $0x10] sm:$0xff] %vm423_vm3, %v465_v43  }
  0xb6   :  { %446 = vst.msk [vmem:[#allocation0 + $0x8] sm:$0xff] %vm423_vm3, %v443_v42   ;;  %v454_v44 = vpop.permute.xlu2 %453  }
  0xb7   :  { %457 = vst.msk [vmem:[#allocation0 + $0x28] sm:$0xff] %vm423_vm3, %v454_v44  }
  0xbc   :  { %v498_v45 = vpop.permute.xlu0 %497  }
  0xbd   :  { %501 = vst.msk [vmem:[#allocation0 + $0x38] sm:$0xff] %vm423_vm3, %v498_v45  }
  0xbe   :  { %v487_v46 = vpop.permute.xlu2 %486   ;;  %v476_v47 = vpop.permute.xlu1 %475  }
  0xbf   :  { %490 = vst.msk [vmem:[#allocation0 + $0x18] sm:$0xff] %vm423_vm3, %v487_v46  }
  0xc0   :  { %479 = vst.msk [vmem:[#allocation0 + $0x30] sm:$0xff] %vm423_vm3, %v476_v47  }
  0xc4   :  { %v530_v48 = vpop.permute.xlu0 %529  }
  0xc5   :  { %533 = vst.msk [vmem:[#allocation0 + $0x8] sm:$0xff] %vm510_vm4, %v530_v48  }
  0xc6   :  { %v519_v49 = vpop.permute.xlu2 %518   ;;  %v509_v50 = vpop.permute.xlu1 %508  }
  0xc7   :  { %522 = vst.msk [vmem:[#allocation0 + $0x20] sm:$0xff] %vm510_vm4, %v519_v49  }
  0xc8   :  { %511 = vst.msk [vmem:[#allocation0] sm:$0xff] %vm510_vm4, %v509_v50  }
  0xcc   :  { %v563_v51 = vpop.permute.xlu0 %562  }
  0xcd   :  { %566 = vst.msk [vmem:[#allocation0 + $0x30] sm:$0xff] %vm510_vm4, %v563_v51  }
  0xce   :  { %v552_v52 = vpop.permute.xlu2 %551   ;;  %v541_v53 = vpop.permute.xlu1 %540  }
  0xcf   :  { %555 = vst.msk [vmem:[#allocation0 + $0x10] sm:$0xff] %vm510_vm4, %v552_v52  }
  0xd0   :  { %544 = vst.msk [vmem:[#allocation0 + $0x28] sm:$0xff] %vm510_vm4, %v541_v53  }
  0xd6   :  { %v585_v54 = vpop.permute.xlu2 %584   ;;  %v574_v55 = vpop.permute.xlu1 %573  }
  0xd7   :  { %588 = vst.msk [vmem:[#allocation0 + $0x38] sm:$0xff] %vm510_vm4, %v585_v54  }
  0xd8   :  { %577 = vst.msk [vmem:[#allocation0 + $0x18] sm:$0xff] %vm510_vm4, %v574_v55  }
  0xd9   :  { %597 = dma.vmem_to_hbm [thread:$0]  %s593_s23, 1024, %s595_s1, [#allocation1]  }
  0xda   :  { %692 = dma.done.wait [#allocation1], 1024  }
  0xdb   :  { %693 = vsyncadd [#allocation1], 4294966272 }
  0xdc   :  { %600 = vsyncpa [#allocation1], 1 }

</bundles_post_ra>
